<compile_context>
chip_gen: v7x
topology: tpu7x:2x2x1
jax: 0.10.0
libtpu: 0.0.40
codegen_flags: <defaults>
</compile_context>

<pallas_src>
import functools

import numpy as np
import jax
import jax.numpy as jnp
from jax.scipy.linalg import cho_factor, cho_solve
from jax.experimental import pallas as pl
from jax.experimental.pallas import tpu as pltpu


# ----------------------------------------------------------------------------
# Fused Pallas kernel:  G = A_cat @ B_cat + l1 * I
#   A_cat: (M, K_tot)   B_cat: (K_tot, N)   (rank-(C+1) correction folded into K)
#   l1 * I added only on diagonal tiles (i == j), in the last k step.
# ----------------------------------------------------------------------------
def _fused_gram_kernel(a_ref, b_ref, o_ref, *, l1):
    # NOTE: program_id / num_programs must be read at the top level of the
    # kernel (NOT inside pl.when bodies), otherwise they end up inside a
    # lax.cond branch with no grid environment and fail to lower.
    i = pl.program_id(0)
    j = pl.program_id(1)
    k = pl.program_id(2)
    nk = pl.num_programs(2)

    @pl.when(k == 0)
    def _init():
        o_ref[...] = jnp.zeros_like(o_ref)

    # Accumulate directly into the f32 output block (resident across k).
    o_ref[...] += jnp.dot(a_ref[...], b_ref[...],
                          preferred_element_type=jnp.float32)

    # Diagonal regularization: only diagonal tiles (tm == tn and i == j) touch
    # the global diagonal.  Padded rows/cols also receive +l1 on their diagonal
    # but are sliced off before the solve, so this is harmless.
    @pl.when(jnp.logical_and(k == nk - 1, i == j))
    def _add_diag():
        tm, tn = o_ref.shape
        r = jax.lax.broadcasted_iota(jnp.int32, (tm, tn), 0)
        c = jax.lax.broadcasted_iota(jnp.int32, (tm, tn), 1)
        o_ref[...] += jnp.where(r == c, jnp.float32(l1), jnp.float32(0.0))


def _round_up(x, m):
    return ((x + m - 1) // m) * m


def _default_tile():
    """Generation-tuned output-tile target (falls back to 512)."""
    try:
        kind = jax.devices()[0].device_kind.lower()
    except Exception:
        return 512
    if "v6" in kind:                       # v6e: 128 MiB VMEM, HBM-bound at 512
        return 1024
    if "v7" in kind or "7x" in kind:       # v7x: 64 MiB VMEM, 3.2 TB/s HBM
        return 768
    return 512                             # v5e & unknown / CPU-interpret


def _dim_tile(dim, target, granule=128):
    """Pick (padded_dim, tile): lane-dense 128 granularity, full block if small,
    otherwise the largest 128-multiple tile whose padding waste is modest."""
    dim_p = _round_up(max(dim, 1), granule)
    if dim_p <= target:
        return dim_p, dim_p
    cands = list(range(target, granule - 1, -granule))
    padded = [_round_up(dim_p, t) for t in cands]
    best = min(padded)
    for t, p in zip(cands, padded):
        if p <= best * 1.25:               # accept <=25% pad waste over optimum
            return p, t
    return best, granule


def _pad2(x, rp, cp):
    r, c = x.shape
    if r == rp and c == cp:
        return x
    return jnp.pad(x, ((0, rp - r), (0, cp - c)))


def fused_regularized_gram(a, b, p, q, l1, *, mxu_dtype=jnp.bfloat16, tile=None):
    """G = a @ b + p @ q + l1 * I  (G square), as ONE tiled Pallas MXU kernel.

    The rank-(C+1) correction (p, q) is concatenated onto the contraction axis,
    so the whole regularized Gram matrix is a single accumulate-over-K matmul
    with a diagonal epilogue on i == j tiles.
    """
    if tile is None:
        tile = _default_tile()
    M, K = a.shape
    K2, N = b.shape
    assert K == K2 and M == N, (a.shape, b.shape)
    Cr = p.shape[1]
    assert p.shape == (M, Cr) and q.shape == (Cr, N), (p.shape, q.shape)

    # Cast to the MXU dtype BEFORE concatenation/padding (halves pad traffic).
    a_cat = jnp.concatenate([a.astype(mxu_dtype), p.astype(mxu_dtype)], axis=1)
    b_cat = jnp.concatenate([b.astype(mxu_dtype), q.astype(mxu_dtype)], axis=0)
    K_tot = K + Cr

    Mp, tm = _dim_tile(M, tile)
    Np, tn = Mp, tm                        # G is square; same tiling makes the
    Kp, tk = _dim_tile(K_tot, min(512, tile))  # i==j diagonal gate exact.

    a_p = _pad2(a_cat, Mp, Kp)
    b_p = _pad2(b_cat, Kp, Np)

    itemsize = jnp.dtype(mxu_dtype).itemsize
    est_vmem = 2 * (tm * tk + tk * tn) * itemsize + 2 * tm * tn * 4
    vmem_limit = int(min(64 * 1024 * 1024, est_vmem + 32 * 1024 * 1024))

    cost = pl.CostEstimate(
        flops=2 * Mp * Np * Kp,
        transcendentals=0,
        bytes_accessed=(Mp * Kp + Kp * Np) * itemsize + Mp * Np * 4)

    out = pl.pallas_call(
        functools.partial(_fused_gram_kernel, l1=float(l1)),
        out_shape=jax.ShapeDtypeStruct((Mp, Np), jnp.float32),
        grid_spec=pltpu.PrefetchScalarGridSpec(
            num_scalar_prefetch=0,
            grid=(Mp // tm, Np // tn, Kp // tk),
            in_specs=[
                # TODO(synk): if profiling shows exposed DMA at large tiles,
                # sweep pipeline_mode=pl.Buffered(3) on these two specs.
                pl.BlockSpec((tm, tk), lambda i, j, k: (i, k)),
                pl.BlockSpec((tk, tn), lambda i, j, k: (k, j)),
            ],
            out_specs=pl.BlockSpec((tm, tn), lambda i, j, k: (i, j)),
        ),
        compiler_params=pltpu.CompilerParams(
            dimension_semantics=("parallel", "parallel", "arbitrary"),
            vmem_limit_bytes=vmem_limit),
        cost_estimate=cost,
    )(a_p, b_p)

    if Mp != M or Np != N:
        out = out[:M, :N]
    return out


# ----------------------------------------------------------------------------
# Training forward (pure function, jitted once per layer config)
# ----------------------------------------------------------------------------
def _grda_train_forward(Xs, Xt, Ys, *, c, lam1, lam2, mxu_dtype, tile):
    Xs = Xs.astype(jnp.float32)
    Xt = Xt.astype(jnp.float32)
    Ys = Ys.astype(jnp.float32)
    Ns, d = Xs.shape
    Nt = Xt.shape[0]
    C = Ys.shape[1]
    n = Ns + Nt

    # graph-laplacian low-rank factors (source block only)
    labels = jnp.argmax(Ys, axis=1)
    onehot = jax.nn.one_hot(labels, C, dtype=jnp.float32)       # O    (Ns, C)
    counts = onehot.sum(axis=0)                                 # (C,)
    inv_counts = jnp.where(counts > 0, 1.0 / counts, 0.0)
    o_scaled = onehot * inv_counts[None, :]                     # O_s  (Ns, C)
    d_vec = o_scaled @ counts                                   # diag(D)  (Ns,)

    # MMD rank-1 factor:  A^T v = mean(Xs) - mean(Xt)
    u = Xs.mean(axis=0) - Xt.mean(axis=0)                       # (d,)

    # Row scaling fuses  A^T W A (== Xs^T Xs)  with  lam1 * Xs^T D Xs.
    row_scale = 1.0 + lam1 * d_vec
    Xs_w = Xs * row_scale[:, None]                              # (Ns, d)

    if n > d:
        # Primal (d x d):
        # G = Xs^T diag(1+lam1 d) Xs - lam1 (Xs^T O_s)(O^T Xs) + lam2 u u^T + c I
        XtO = Xs.T @ onehot                                     # (d, C)
        P = jnp.concatenate([-lam1 * (XtO * inv_counts[None, :]),
                             lam2 * u[:, None]], axis=1)        # (d, C+1)
        Q = jnp.concatenate([XtO.T, u[None, :]], axis=0)        # (C+1, d)
        G = fused_regularized_gram(Xs_w.T, Xs, P, Q, c,
                                   mxu_dtype=mxu_dtype, tile=tile)
        # Primal G is symmetric positive definite (PSD Gram terms + c I).
        G = 0.5 * (G + G.T)
        rhs = Xs.T @ Ys                                         # == A^T [Ys; 0]
        weight = cho_solve(cho_factor(G), rhs)                  # (d, C)
    else:
        # Dual (n x n):
        # G = B A^T - lam1 R (O^T Xs A^T) + lam2 v (A u)^T + c I   (NOT symmetric)
        A = jnp.concatenate([Xs, Xt], axis=0)                   # (n, d)
        At = A.T                                                # (d, n)
        B = jnp.concatenate([Xs_w, jnp.zeros((Nt, d), jnp.float32)], axis=0)
        v = jnp.concatenate([jnp.full((Ns,), 1.0 / Ns, jnp.float32),
                             jnp.full((Nt,), -1.0 / Nt, jnp.float32)])
        Au = A @ u                                              # (n,)
        S = (onehot.T @ Xs) @ At                                # (C, n)
        R = jnp.concatenate([o_scaled, jnp.zeros((Nt, C), jnp.float32)], axis=0)
        P = jnp.concatenate([-lam1 * R, lam2 * v[:, None]], axis=1)   # (n, C+1)
        Q = jnp.concatenate([S, Au[None, :]], axis=0)                 # (C+1, n)
        G = fused_regularized_gram(B, At, P, Q, c,
                                   mxu_dtype=mxu_dtype, tile=tile)
        Y_full = jnp.concatenate([Ys, jnp.zeros((Nt, C), jnp.float32)], axis=0)
        weight = At @ jnp.linalg.solve(G, Y_full)               # (d, C)

    out = Xs @ weight
    return out, weight


# ----------------------------------------------------------------------------
# GRDAOutput module (JAX / Pallas)
# ----------------------------------------------------------------------------
class GRDAOutputPallas:
    def __init__(self, in_features, out_features, c, lam1, lam2, key,
                 mxu_dtype=jnp.bfloat16, tile=None):
        """mxu_dtype: dtype of the MXU input streams of the big Gram matmul
        (accumulation is always f32).  Pass jnp.float32 for strict accuracy."""
        self.in_features = in_features
        self.out_features = out_features
        self.c = float(c)
        self.lam1 = float(lam1)
        self.lam2 = float(lam2)
        self.weight = jax.random.normal(
            key, (in_features, out_features), dtype=jnp.float32)
        self.training = True
        self.pinvOfInput = None
        self._train = jax.jit(functools.partial(
            _grda_train_forward, c=self.c, lam1=self.lam1, lam2=self.lam2,
            mxu_dtype=mxu_dtype, tile=tile))
        self._eval = jax.jit(lambda X, W: X @ W)

    # kept for API parity with the torch module; the forward path uses the
    # rank-C factors directly instead of this dense N x N matrix.
    def laplacian(self, y):
        labels = jnp.argmax(y, axis=1)
        nclass = y.shape[1]
        onehot = jax.nn.one_hot(labels, nclass, dtype=jnp.float32)
        counts = onehot.sum(axis=0)
        inv_counts = jnp.where(counts > 0, 1.0 / counts, 0.0)
        W = (onehot * inv_counts[None, :]) @ onehot.T
        return jnp.diag(W.sum(axis=1)) - W

    def forward(self, *args):
        if self.training:
            Xs, Xt, Ys = args
            out, weight = self._train(Xs, Xt, Ys)
            self.weight = weight
            # TODO(synk): pinvOfInput (G^{-1} A^T resp. A^T G^{-1}) is not
            # materialized; the weight is obtained via a Cholesky / LU solve.
            self.pinvOfInput = None
            return out
        else:
            Xt = args[0]
            return self._eval(Xt, self.weight)


# ----------------------------------------------------------------------------
# Pure-numpy (float64) reference for verification
# ----------------------------------------------------------------------------
def _reference_forward(Xs, Xt, Ys, c, lam1, lam2):
    Xs, Xt, Ys = (np.asarray(x, np.float64) for x in (Xs, Xt, Ys))
    Ns, Nt, d = Xs.shape[0], Xt.shape[0], Xs.shape[1]
    Y = np.vstack([Ys, np.zeros((Nt, Ys.shape[1]))])
    labels = np.argmax(Ys, axis=1)
    W = np.zeros((Ns, Ns))
    for cl in np.unique(labels):
        yc = (labels[np.newaxis] == cl).astype(np.float64)
        W += yc.T @ yc / yc.sum()
    L_ss = np.diag(W.sum(1)) - W
    L = np.zeros((Ns + Nt, Ns + Nt)); L[:Ns, :Ns] = L_ss
    V = np.block([[np.ones((Ns, Ns)) / (Ns * Ns), -np.ones((Ns, Nt)) / (Ns * Nt)],
                  [-np.ones((Nt, Ns)) / (Nt * Ns), np.ones((Nt, Nt)) / (Nt * Nt)]])
    A = np.vstack([Xs, Xt])
    Wb = np.zeros((Ns + Nt, Ns + Nt)); Wb[:Ns, :Ns] = np.eye(Ns)
    if Ns + Nt > d:
        G = A.T @ Wb @ A + c * np.eye(d) + lam1 * A.T @ L @ A + lam2 * A.T @ V @ A
        pinv = np.linalg.inv(G) @ A.T
    else:
        G = Wb @ A @ A.T + c * np.eye(Ns + Nt) + lam1 * L @ A @ A.T + lam2 * V @ A @ A.T
        pinv = A.T @ np.linalg.inv(G)
    weight = pinv @ Y
    return Xs @ weight, weight


# ----------------------------------------------------------------------------
if __name__ == "__main__":
    key = jax.random.PRNGKey(0)
    k_w, k_xs, k_xt, k_lab, k_xs2, k_xt2 = jax.random.split(key, 6)

    # small shapes: Ns = Nt = 8 samples, in_features = 8, out_features = 4
    Ns, Nt, in_features, out_features = 8, 8, 8, 4
    c, lam1, lam2 = 0.1, 0.01, 0.01

    Xs = jax.random.normal(k_xs, (Ns, in_features), jnp.float32)
    Xt = jax.random.normal(k_xt, (Nt, in_features), jnp.float32)
    labels = jax.random.randint(k_lab, (Ns,), 0, out_features)
    Ys = jax.nn.one_hot(labels, out_features, dtype=jnp.float32)

    # ---- strict-accuracy instance (f32 MXU inputs), primal path (Ns+Nt > d) ----
    layer = GRDAOutputPallas(in_features, out_features, c, lam1, lam2, k_w,
                             mxu_dtype=jnp.float32)
    layer.training = True
    out_train = jax.block_until_ready(layer.forward(Xs, Xt, Ys))
    ref_out, ref_w = _reference_forward(Xs, Xt, Ys, c, lam1, lam2)
    assert out_train.shape == (Ns, out_features)
    assert np.all(np.isfinite(np.asarray(out_train)))
    assert np.allclose(np.asarray(out_train), ref_out, rtol=1e-2, atol=1e-2)
    assert np.allclose(np.asarray(layer.weight), ref_w, rtol=1e-2, atol=1e-2)

    # ---- strict-accuracy instance, wide features (Ns+Nt <= d -> dual path) ----
    d_wide = 32
    Xs2 = jax.random.normal(k_xs2, (Ns, d_wide), jnp.float32)
    Xt2 = jax.random.normal(k_xt2, (Nt, d_wide), jnp.float32)
    layer2 = GRDAOutputPallas(d_wide, out_features, c, lam1, lam2, k_w,
                              mxu_dtype=jnp.float32)
    out2 = jax.block_until_ready(layer2.forward(Xs2, Xt2, Ys))
    ref_out2, ref_w2 = _reference_forward(Xs2, Xt2, Ys, c, lam1, lam2)
    assert np.allclose(np.asarray(out2), ref_out2, rtol=1e-2, atol=1e-2)
    assert np.allclose(np.asarray(layer2.weight), ref_w2, rtol=1e-2, atol=1e-2)

    # ---- default fast path (bf16 MXU inputs, f32 accumulation) ----
    c_fast = 1.0   # well-conditioned demo config for the low-precision path
    layer_fast = GRDAOutputPallas(in_features, out_features, c_fast, lam1, lam2, k_w)
    out_fast = jax.block_until_ready(layer_fast.forward(Xs, Xt, Ys))
    ref_fast, _ = _reference_forward(Xs, Xt, Ys, c_fast, lam1, lam2)
    assert np.all(np.isfinite(np.asarray(out_fast)))
    rel = (np.linalg.norm(np.asarray(out_fast, np.float64) - ref_fast)
           / max(np.linalg.norm(ref_fast), 1e-6))
    assert rel < 0.5, rel   # loose check: bf16 Gram feeds a linear solve

    # ---- test (eval) forward: Xt @ weight ----
    layer.training = False
    out_test = jax.block_until_ready(layer.forward(Xt))
    ref_test = np.asarray(Xt, np.float64) @ np.asarray(layer.weight, np.float64)
    assert out_test.shape == (Nt, out_features)
    assert np.allclose(np.asarray(out_test), ref_test, rtol=1e-2, atol=1e-2)

    print("KERNEL_OK")
</pallas_src>

<mosaic_0001>
module attributes {stable_mosaic.version = 11 : i64} {
  func.func @_fused_gram_kernel(%arg0: i32, %arg1: i32, %arg2: i32, %arg3: memref<128x128xf32, #tpu.memory_space<vmem>>, %arg4: memref<128x128xf32, #tpu.memory_space<vmem>>, %arg5: memref<128x128xf32, #tpu.memory_space<vmem>>) attributes {dimension_semantics = [#tpu.dimension_semantics<parallel>, #tpu.dimension_semantics<parallel>, #tpu.dimension_semantics<arbitrary>], iteration_bounds = array<i64: 1, 1, 1>, scalar_prefetch = 0 : i64, scratch_operands = 0 : i64, tpu.core_type = #tpu.core_type<tc>, window_params = [{transform_indices = @transform_0, window_bounds = array<i64: 128, 128>}, {transform_indices = @transform_1, window_bounds = array<i64: 128, 128>}, {transform_indices = @transform_2, window_bounds = array<i64: 128, 128>}]} {
    %c0_i32 = arith.constant 0 : i32
    %0 = arith.cmpi eq, %arg2, %c0_i32 : i32
    %1 = arith.extui %0 : i1 to i32
    %c0_i32_0 = arith.constant 0 : i32
    %2 = arith.cmpi ne, %1, %c0_i32_0 : i32
    scf.if %2 {
      %cst_10 = arith.constant 0.000000e+00 : f32
      %14 = vector.broadcast %cst_10 : f32 to vector<128x128xf32>
      %c0_11 = arith.constant 0 : index
      %c0_12 = arith.constant 0 : index
      %15 = vector.load %arg5[%c0_11, %c0_12] : memref<128x128xf32, #tpu.memory_space<vmem>>, vector<128x128xf32>
      tpu.vector_store %arg5[%c0_11, %c0_12], %14 {strides = array<i32>} : memref<128x128xf32, #tpu.memory_space<vmem>>, vector<128x128xf32>,
    } else {
    }
    %c0 = arith.constant 0 : index
    %c0_1 = arith.constant 0 : index
    %3 = vector.load %arg5[%c0, %c0_1] : memref<128x128xf32, #tpu.memory_space<vmem>>, vector<128x128xf32>
    %c0_2 = arith.constant 0 : index
    %c0_3 = arith.constant 0 : index
    %4 = vector.load %arg3[%c0_2, %c0_3] : memref<128x128xf32, #tpu.memory_space<vmem>>, vector<128x128xf32>
    %c0_4 = arith.constant 0 : index
    %c0_5 = arith.constant 0 : index
    %5 = vector.load %arg4[%c0_4, %c0_5] : memref<128x128xf32, #tpu.memory_space<vmem>>, vector<128x128xf32>
    %cst = arith.constant dense<0.000000e+00> : vector<128x128xf32>
    %6 = tpu.matmul %4, %5, %cst {dimension_numbers = #tpu.dot_dimension_numbers<[1], [0], [0], [1], [0, 0, 1, 1], [], []>} : vector<128x128xf32>, vector<128x128xf32>, vector<128x128xf32> -> vector<128x128xf32>
    %7 = arith.addf %3, %6 : vector<128x128xf32>
    %c0_6 = arith.constant 0 : index
    %c0_7 = arith.constant 0 : index
    %8 = vector.load %arg5[%c0_6, %c0_7] : memref<128x128xf32, #tpu.memory_space<vmem>>, vector<128x128xf32>
    tpu.vector_store %arg5[%c0_6, %c0_7], %7 {strides = array<i32>} : memref<128x128xf32, #tpu.memory_space<vmem>>, vector<128x128xf32>,
    %c0_i32_8 = arith.constant 0 : i32
    %9 = arith.cmpi eq, %arg2, %c0_i32_8 : i32
    %10 = arith.cmpi eq, %arg0, %arg1 : i32
    %11 = arith.andi %9, %10 : i1
    %12 = arith.extui %11 : i1 to i32
    %c0_i32_9 = arith.constant 0 : i32
    %13 = arith.cmpi ne, %12, %c0_i32_9 : i32
    scf.if %13 {
      %14 = tpu.iota {dimensions = array<i32: 0>} : vector<128x128xi32>
      %15 = tpu.iota {dimensions = array<i32: 1>} : vector<128x128xi32>
      %c0_10 = arith.constant 0 : index
      %c0_11 = arith.constant 0 : index
      %16 = vector.load %arg5[%c0_10, %c0_11] : memref<128x128xf32, #tpu.memory_space<vmem>>, vector<128x128xf32>
      %17 = arith.cmpi eq, %14, %15 : vector<128x128xi32>
      %cst_12 = arith.constant 1.000000e-01 : f32
      %cst_13 = arith.constant 0.000000e+00 : f32
      %18 = vector.broadcast %cst_12 : f32 to vector<128x128xf32>
      %19 = vector.broadcast %cst_13 : f32 to vector<128x128xf32>
      %20 = arith.select %17, %18, %19 : vector<128x128xi1>, vector<128x128xf32>
      %21 = arith.addf %16, %20 : vector<128x128xf32>
      %c0_14 = arith.constant 0 : index
      %c0_15 = arith.constant 0 : index
      %22 = vector.load %arg5[%c0_14, %c0_15] : memref<128x128xf32, #tpu.memory_space<vmem>>, vector<128x128xf32>
      tpu.vector_store %arg5[%c0_14, %c0_15], %21 {strides = array<i32>} : memref<128x128xf32, #tpu.memory_space<vmem>>, vector<128x128xf32>,
    } else {
    }
    return
  }
  func.func @transform_0(%arg0: i32, %arg1: i32, %arg2: i32) -> (i32, i32) {
    %c0_i32 = arith.constant 0 : i32
    return %arg0, %arg2 : i32, i32
  }
  func.func @transform_1(%arg0: i32, %arg1: i32, %arg2: i32) -> (i32, i32) {
    %c0_i32 = arith.constant 0 : i32
    return %arg2, %arg1 : i32, i32
  }
  func.func @transform_2(%arg0: i32, %arg1: i32, %arg2: i32) -> (i32, i32) {
    %c0_i32 = arith.constant 0 : i32
    return %arg0, %arg1 : i32, i32
  }
}

</mosaic_0001>

<bundles_post_ra>
// kernel: custom-call.6
= control target key start
LH: loop header
LB: loop body
LE: loop exit
PB: predicated region body
PF: predicated region fallthrough
CT: control target
= control target key end

     0   :  { %v264_v0 = vmov 0.0   ;;  %vm35_vm0 = vcmask 7168   ;;  %vm53_vm1 = vcmask 15368   ;;  %vm70_vm2 = vcmask 1047553   ;;  %s292_s0 = inlined_call_operand.vmem [shape: f32[8,8], index: 0, kind: input, shape index: {}]   ;;  %s293_s1 = inlined_call_operand.vmem [shape: f32[8,8], index: 1, kind: output, shape index: {}]  }
   0x1   :  { %34 = vst [vmem:[#allocation1] sm:$0xff] %v264_v0  ;;  %v278_v4 = vld [vmem:[%s292_s0] sm:$0xff]  ;;  %vm71_vm3 = vmand %vm53_vm1, %vm70_vm2  ;;  %vm75_vm4 = vcmask 23568   ;;  %vm92_vm5 = vcmask 1047554   ;;  %vm97_vm7 = vcmask 31768   ;;  %vm114_vm8 = vcmask 1047555  }
   0x2   :  { %30 = vst [vmem:[#allocation0] sm:$0xff] %v278_v4  ;;  %vm93_vm6 = vmand %vm75_vm4, %vm92_vm5  ;;  %vm119_vm10 = vcmask 39968   ;;  %vm136_vm11 = vcmask 1047556   ;;  %vm141_vm13 = vcmask 48168   ;;  %vm158_vm14 = vcmask 1047557  }
   0x3   :  { %vm115_vm9 = vmand %vm97_vm7, %vm114_vm8  ;;  %vm180_vm1 = vcmask 1047558   ;;  %vm202_vm4 = vcmask 1047559  }
   0x4   :  { %vm137_vm12 = vmand %vm119_vm10, %vm136_vm11 }
   0x5   :  { %vm159_vm15 = vmand %vm141_vm13, %vm158_vm14 }
   0x8   :  { %v36_v1 = vld [vmem:[#allocation1] ss:$0 sm:$0xff] }
   0x9   :  { %v38_v2 = vmul.f32 %v36_v1, %v36_v1  ;;  %v45_v3 = vmul.f32 0.0, %v36_v1  ;;  %v37_v5 = vld [vmem:[#allocation0] ss:$0 sm:$0xff]  ;;  %v57_v16 = vld [vmem:[#allocation0 + $0x1] ss:$0 sm:$0xff] }
   0xa   :  { %v79_v28 = vld [vmem:[#allocation0 + $0x2] ss:$0 sm:$0xff]  ;;  %v101_v40 = vld [vmem:[#allocation0 + $0x3] ss:$0 sm:$0xff]  ;;  %v123_v52 = vld [vmem:[#allocation0 + $0x4] ss:$0 sm:$0xff] }
   0xb   :  { %39 = vadd.xlane.f32.xlu0 %v38_v2  ;;  %v145_v0 = vld [vmem:[#allocation0 + $0x5] ss:$0 sm:$0xff] }
   0xf   :  { %46 = vadd.xlane.f32.xlu0 %v45_v3 }
  0x98   :  { %v40_v6 = vpop.xlane.xlu0 %39 }
  0x99   :  { %v41_v7 = vsub.f32 %v37_v5, %v40_v6 }
  0x9b   :  { %248 = vrsqrt.f32 %v41_v7 }
  0x9c   :  { %v47_v8 = vpop.xlane.xlu0 %46 }
  0x9d   :  { %v48_v9 = vsub.f32 %v278_v4, %v47_v8 }
  0xa5   :  { %v249_v10 = vpop.eup %248 }
  0xa6   :  { %v49_v11 = vmul.f32 %v249_v10, %v48_v9 }
  0xa8   :  { %v50_v12 = vsel %vm35_vm0, %v49_v11, 0.0  ;;  %vm163_vm0 = vcmask 56368  }
  0xa9   :  { %52 = vst [vmem:[#allocation1] sm:$0xff] %v50_v12  ;;  %vm181_vm2 = vmand %vm163_vm0, %vm180_vm1 }
  0xb0   :  { %v55_v13 = vld [vmem:[#allocation1 + $0x1] ss:$0 sm:$0xff] }
  0xb1   :  { %v58_v14 = vmul.f32 %v55_v13, %v55_v13  ;;  %v65_v15 = vmul.f32 %v55_v13, %v50_v12  ;;  %v167_v13 = vld [vmem:[#allocation0 + $0x6] ss:$0 sm:$0xff] }
  0xb3   :  { %59 = vadd.xlane.f32.xlu1 %v58_v14 }
  0xb7   :  { %66 = vadd.xlane.f32.xlu1 %v65_v15 }
 0x140   :  { %v60_v17 = vpop.xlane.xlu1 %59 }
 0x141   :  { %v61_v18 = vsub.f32 %v57_v16, %v60_v17 }
 0x143   :  { %250 = vrsqrt.f32 %v61_v18 }
 0x144   :  { %v67_v19 = vpop.xlane.xlu1 %66 }
 0x145   :  { %v68_v20 = vsub.f32 %v278_v4, %v67_v19 }
 0x14d   :  { %v251_v21 = vpop.eup %250 }
 0x14e   :  { %v69_v22 = vmul.f32 %v251_v21, %v68_v20 }
 0x150   :  { %v72_v23 = vsel %vm71_vm3, %v69_v22, 0.0  ;;  %vm185_vm3 = vcmask 64568  }
 0x151   :  { %v73_v24 = vadd.f32 %v72_v23, %v50_v12  ;;  %vm203_vm5 = vmand %vm185_vm3, %vm202_vm4 }
 0x153   :  { %74 = vst [vmem:[#allocation1] sm:$0xff] %v73_v24 }
 0x15a   :  { %v77_v25 = vld [vmem:[#allocation1 + $0x2] ss:$0 sm:$0xff] }
 0x15b   :  { %v87_v26 = vmul.f32 %v77_v25, %v73_v24  ;;  %v80_v27 = vmul.f32 %v77_v25, %v77_v25  ;;  %v189_v25 = vld [vmem:[#allocation0 + $0x7] ss:$0 sm:$0xff] }
 0x15d   :  { %88 = vadd.xlane.f32.xlu1 %v87_v26  ;;  %81 = vadd.xlane.f32.xlu0 %v80_v27 }
 0x1ea   :  { %v82_v29 = vpop.xlane.xlu0 %81  ;;  %v89_v31 = vpop.xlane.xlu1 %88 }
 0x1eb   :  { %v83_v30 = vsub.f32 %v79_v28, %v82_v29  ;;  %v90_v32 = vsub.f32 %v278_v4, %v89_v31 }
 0x1ed   :  { %252 = vrsqrt.f32 %v83_v30 }
 0x1f7   :  { %v253_v33 = vpop.eup %252 }
 0x1f8   :  { %v91_v34 = vmul.f32 %v253_v33, %v90_v32 }
 0x1fa   :  { %v94_v35 = vsel %vm93_vm6, %v91_v34, 0.0 }
 0x1fb   :  { %v95_v36 = vadd.f32 %v94_v35, %v73_v24 }
 0x1fd   :  { %96 = vst [vmem:[#allocation1] sm:$0xff] %v95_v36 }
 0x204   :  { %v99_v37 = vld [vmem:[#allocation1 + $0x3] ss:$0 sm:$0xff] }
 0x205   :  { %v109_v38 = vmul.f32 %v99_v37, %v95_v36  ;;  %v102_v39 = vmul.f32 %v99_v37, %v99_v37 }
 0x207   :  { %110 = vadd.xlane.f32.xlu1 %v109_v38  ;;  %103 = vadd.xlane.f32.xlu0 %v102_v39 }
 0x294   :  { %v104_v41 = vpop.xlane.xlu0 %103  ;;  %v111_v43 = vpop.xlane.xlu1 %110 }
 0x295   :  { %v105_v42 = vsub.f32 %v101_v40, %v104_v41  ;;  %v112_v44 = vsub.f32 %v278_v4, %v111_v43 }
 0x297   :  { %254 = vrsqrt.f32 %v105_v42 }
 0x2a1   :  { %v255_v45 = vpop.eup %254 }
 0x2a2   :  { %v113_v46 = vmul.f32 %v255_v45, %v112_v44 }
 0x2a4   :  { %v116_v47 = vsel %vm115_vm9, %v113_v46, 0.0 }
 0x2a5   :  { %v117_v48 = vadd.f32 %v116_v47, %v95_v36 }
 0x2a7   :  { %118 = vst [vmem:[#allocation1] sm:$0xff] %v117_v48 }
 0x2ae   :  { %v121_v49 = vld [vmem:[#allocation1 + $0x4] ss:$0 sm:$0xff] }
 0x2af   :  { %v131_v50 = vmul.f32 %v121_v49, %v117_v48  ;;  %v124_v51 = vmul.f32 %v121_v49, %v121_v49 }
 0x2b1   :  { %132 = vadd.xlane.f32.xlu1 %v131_v50  ;;  %125 = vadd.xlane.f32.xlu0 %v124_v51 }
 0x33e   :  { %v126_v53 = vpop.xlane.xlu0 %125  ;;  %v133_v55 = vpop.xlane.xlu1 %132 }
 0x33f   :  { %v127_v54 = vsub.f32 %v123_v52, %v126_v53  ;;  %v134_v56 = vsub.f32 %v278_v4, %v133_v55 }
 0x341   :  { %256 = vrsqrt.f32 %v127_v54 }
 0x34b   :  { %v257_v57 = vpop.eup %256 }
 0x34c   :  { %v135_v58 = vmul.f32 %v257_v57, %v134_v56 }
 0x34e   :  { %v138_v59 = vsel %vm137_vm12, %v135_v58, 0.0 }
 0x34f   :  { %v139_v60 = vadd.f32 %v138_v59, %v117_v48 }
 0x351   :  { %140 = vst [vmem:[#allocation1] sm:$0xff] %v139_v60 }
 0x358   :  { %v143_v61 = vld [vmem:[#allocation1 + $0x5] ss:$0 sm:$0xff] }
 0x359   :  { %v153_v62 = vmul.f32 %v143_v61, %v139_v60  ;;  %v146_v63 = vmul.f32 %v143_v61, %v143_v61 }
 0x35b   :  { %154 = vadd.xlane.f32.xlu1 %v153_v62  ;;  %147 = vadd.xlane.f32.xlu0 %v146_v63 }
 0x3e8   :  { %v148_v1 = vpop.xlane.xlu0 %147  ;;  %v155_v3 = vpop.xlane.xlu1 %154 }
 0x3e9   :  { %v149_v2 = vsub.f32 %v145_v0, %v148_v1  ;;  %v156_v5 = vsub.f32 %v278_v4, %v155_v3 }
 0x3eb   :  { %258 = vrsqrt.f32 %v149_v2 }
 0x3f5   :  { %v259_v6 = vpop.eup %258 }
 0x3f6   :  { %v157_v7 = vmul.f32 %v259_v6, %v156_v5 }
 0x3f8   :  { %v160_v8 = vsel %vm159_vm15, %v157_v7, 0.0 }
 0x3f9   :  { %v161_v9 = vadd.f32 %v160_v8, %v139_v60 }
 0x3fb   :  { %162 = vst [vmem:[#allocation1] sm:$0xff] %v161_v9 }
 0x402   :  { %v165_v10 = vld [vmem:[#allocation1 + $0x6] ss:$0 sm:$0xff] }
 0x403   :  { %v175_v11 = vmul.f32 %v165_v10, %v161_v9  ;;  %v168_v12 = vmul.f32 %v165_v10, %v165_v10 }
 0x405   :  { %176 = vadd.xlane.f32.xlu1 %v175_v11  ;;  %169 = vadd.xlane.f32.xlu0 %v168_v12 }
 0x492   :  { %v170_v14 = vpop.xlane.xlu0 %169  ;;  %v177_v16 = vpop.xlane.xlu1 %176 }
 0x493   :  { %v171_v15 = vsub.f32 %v167_v13, %v170_v14  ;;  %v178_v17 = vsub.f32 %v278_v4, %v177_v16 }
 0x495   :  { %260 = vrsqrt.f32 %v171_v15 }
 0x49f   :  { %v261_v18 = vpop.eup %260 }
 0x4a0   :  { %v179_v19 = vmul.f32 %v261_v18, %v178_v17 }
 0x4a2   :  { %v182_v20 = vsel %vm181_vm2, %v179_v19, 0.0 }
 0x4a3   :  { %v183_v21 = vadd.f32 %v182_v20, %v161_v9 }
 0x4a5   :  { %184 = vst [vmem:[#allocation1] sm:$0xff] %v183_v21 }
 0x4ac   :  { %v187_v22 = vld [vmem:[#allocation1 + $0x7] ss:$0 sm:$0xff] }
 0x4ad   :  { %v197_v23 = vmul.f32 %v187_v22, %v183_v21  ;;  %v190_v24 = vmul.f32 %v187_v22, %v187_v22 }
 0x4af   :  { %198 = vadd.xlane.f32.xlu1 %v197_v23  ;;  %191 = vadd.xlane.f32.xlu0 %v190_v24 }
 0x53c   :  { %v192_v26 = vpop.xlane.xlu0 %191  ;;  %v199_v28 = vpop.xlane.xlu1 %198 }
 0x53d   :  { %v193_v27 = vsub.f32 %v189_v25, %v192_v26  ;;  %v200_v29 = vsub.f32 %v278_v4, %v199_v28 }
 0x53f   :  { %262 = vrsqrt.f32 %v193_v27 }
 0x549   :  { %v263_v30 = vpop.eup %262 }
 0x54a   :  { %v201_v31 = vmul.f32 %v263_v30, %v200_v29 }
 0x54c   :  { %v204_v32 = vsel %vm203_vm5, %v201_v31, 0.0 }
 0x54d   :  { %v205_v33 = vadd.f32 %v204_v32, %v183_v21 }
 0x54f   :  { %206 = vst [vmem:[#allocation1] sm:$0xff] %v205_v33  ;;  %235 = vst [vmem:[%s293_s1] sm:$0xff] %v205_v33 }

// kernel: custom-call.7
= control target key start
LH: loop header
LB: loop body
LE: loop exit
PB: predicated region body
PF: predicated region fallthrough
CT: control target
= control target key end

     0   :  { %v34_v0 = vlaneseq  ;;  %v179_v9 = vmov -1.0   ;;  %s214_s0 = inlined_call_operand.vmem [shape: f32[1,8,8], index: 0, kind: input, shape index: {}]   ;;  %s215_s1 = inlined_call_operand.vmem [shape: f32[1,8,8], index: 1, kind: output, shape index: {}]  }
   0x1   :  { %v29_v1 = vld [vmem:[%s214_s0] sm:$0xff] }
   0x2   :  { %v193_v2 = vand.u32 127, %v34_v0  ;;  %v38_v3 = vshrl.u32 %v34_v0, 7 }
   0x4   :  { %vm36_vm0 = vcmp.lt.s32.totalorder %v193_v2, 8  ;;  %vm40_vm1 = vcmp.eq.s32.totalorder %v38_v3, %v193_v2  ;;  %vm45_vm2 = vcmp.le.s32.totalorder %v38_v3, %v193_v2  ;;  %vm59_vm4 = vcmp.eq.s32.totalorder %v193_v2, 7 }
   0x5   :  { %v42_v4 = vsel %vm40_vm1, %v29_v1, 0.0  ;;  %vm46_vm3 = vmand %vm45_vm2, %vm36_vm0  ;;  %vm56_vm5 = vcmp.eq.s32.totalorder %v193_v2, %v38_v3  ;;  %v60_v10 = vsel %vm59_vm4, 1.0, %v179_v9  ;;  %vm67_vm6 = vcmp.eq.s32.totalorder %v193_v2, 6 }
   0x6   :  { %v47_v5 = vsel %vm46_vm3, %v29_v1, 0.0  ;;  %43 = vadd.xlane.f32.xlu0 %v42_v4  ;;  %v61_v11 = vsel %vm56_vm5, %v60_v10, 0.0  ;;  %vm77_vm7 = vcmp.eq.s32.totalorder %v193_v2, 5  ;;  %vm87_vm8 = vcmp.eq.s32.totalorder %v193_v2, 4 }
   0x7   :  { %vm97_vm9 = vcmp.eq.s32.totalorder %v193_v2, 3  ;;  %vm107_vm10 = vcmp.eq.s32.totalorder %v193_v2, 2  ;;  %vm117_vm11 = vcmp.eq.s32.totalorder %v193_v2, 1  ;;  %vm126_vm12 = vcmp.eq.s32.totalorder %v193_v2, 0 }
  0x93   :  { %v198_v6 = vpop.xlane.xlu0 %43 }
  0x94   :  { %177 = vrcp.f32 %v198_v6  ;;  %vm133_vm13 = vweird.f32 %v198_v6 }
  0x9e   :  { %v178_v7 = vpop.eup %177 }
  0x9f   :  { %v49_v8 = vmul.f32 %v178_v7, %v47_v5 }
  0xa1   :  { %50 = vst [vmem:[#allocation2] sm:$0xff] %v49_v8 }
  0xa8   :  { %v63_v12 = vld [vmem:[#allocation2 + $0x6] ss:$0 sm:$0xff]  ;;  %v73_v15 = vld [vmem:[#allocation2 + $0x5] ss:$0 sm:$0xff]  ;;  %v83_v20 = vld [vmem:[#allocation2 + $0x4] ss:$0 sm:$0xff] }
  0xa9   :  { %v64_v13 = vxor.u32 2147483648, %v63_v12  ;;  %v74_v17 = vxor.u32 2147483648, %v73_v15  ;;  %v84_v22 = vxor.u32 2147483648, %v83_v20  ;;  %v93_v25 = vld [vmem:[#allocation2 + $0x3] ss:$0 sm:$0xff] }
  0xaa   :  { %v94_v27 = vxor.u32 2147483648, %v93_v25  ;;  %v103_v30 = vld [vmem:[#allocation2 + $0x2] ss:$0 sm:$0xff]  ;;  %v113_v35 = vld [vmem:[#allocation2 + $0x1] ss:$0 sm:$0xff] }
  0xab   :  { %v68_v14 = vmul.f32 %v64_v13, %v61_v11  ;;  %v104_v32 = vxor.u32 2147483648, %v103_v30  ;;  %v114_v37 = vxor.u32 2147483648, %v113_v35  ;;  %v122_v40 = vld [vmem:[#allocation2] ss:$0 sm:$0xff] }
  0xac   :  { %v123_v42 = vxor.u32 2147483648, %v122_v40 }
  0xad   :  { %69 = vadd.xlane.f32.xlu0 %v68_v14 }
 0x13a   :  { %v70_v16 = vpop.xlane.xlu0 %69 }
 0x13b   :  { %v71_v18 = vsel %vm67_vm6, %v70_v16, %v61_v11 }
 0x13c   :  { %v78_v19 = vmul.f32 %v74_v17, %v71_v18 }
 0x13e   :  { %79 = vadd.xlane.f32.xlu1 %v78_v19 }
 0x1cb   :  { %v80_v21 = vpop.xlane.xlu1 %79 }
 0x1cc   :  { %v81_v23 = vsel %vm77_vm7, %v80_v21, %v71_v18 }
 0x1cd   :  { %v88_v24 = vmul.f32 %v84_v22, %v81_v23 }
 0x1cf   :  { %89 = vadd.xlane.f32.xlu1 %v88_v24 }
 0x25c   :  { %v90_v26 = vpop.xlane.xlu1 %89 }
 0x25d   :  { %v91_v28 = vsel %vm87_vm8, %v90_v26, %v81_v23 }
 0x25e   :  { %v98_v29 = vmul.f32 %v94_v27, %v91_v28 }
 0x260   :  { %99 = vadd.xlane.f32.xlu0 %v98_v29 }
 0x2ed   :  { %v100_v31 = vpop.xlane.xlu0 %99 }
 0x2ee   :  { %v101_v33 = vsel %vm97_vm9, %v100_v31, %v91_v28 }
 0x2ef   :  { %v108_v34 = vmul.f32 %v104_v32, %v101_v33 }
 0x2f1   :  { %109 = vadd.xlane.f32.xlu1 %v108_v34 }
 0x37e   :  { %v110_v36 = vpop.xlane.xlu1 %109 }
 0x37f   :  { %v111_v38 = vsel %vm107_vm10, %v110_v36, %v101_v33 }
 0x380   :  { %v118_v39 = vmul.f32 %v114_v37, %v111_v38 }
 0x382   :  { %119 = vadd.xlane.f32.xlu0 %v118_v39 }
 0x40f   :  { %v120_v41 = vpop.xlane.xlu0 %119 }
 0x410   :  { %v121_v43 = vsel %vm117_vm11, %v120_v41, %v111_v38 }
 0x411   :  { %v127_v44 = vmul.f32 %v123_v42, %v121_v43 }
 0x413   :  { %128 = vadd.xlane.f32.xlu1 %v127_v44 }
 0x4a0   :  { %v129_v45 = vpop.xlane.xlu1 %128 }
 0x4a1   :  { %v130_v46 = vsel %vm126_vm12, %v129_v45, %v121_v43 }
 0x4a2   :  { %v132_v47 = vmul.f32 %v178_v7, %v130_v46 }
 0x4a4   :  { %v134_v48 = vsel %vm133_vm13, %v130_v46, %v132_v47 }
 0x4a5   :  { %164 = vst [vmem:[%s215_s1] sm:$0xff] %v134_v48 }

// kernel: _grda_train_forward.1
= control target key start
LH: loop header
LB: loop body
LE: loop exit
PB: predicated region body
PF: predicated region fallthrough
CT: control target
= control target key end

     0   :  { %v261_v40 = vlaneseq  ;;  %v501_v50 = vmov 0.0   ;;  %s703_s1 = inlined_call_operand.vmem [shape: f32[128,128], index: 1, kind: input, shape index: {}]   ;;  %s704_s0 = inlined_call_operand.vmem [shape: f32[128,128], index: 0, kind: input, shape index: {}]   ;;  %s705_s2 = inlined_call_operand.vmem [shape: f32[128,128], index: 2, kind: output, shape index: {}]  }
   0x1   :  { %v63_v0 = vld [vmem:[%s703_s1] sm:$0xff]  ;;  %v64_v1 = vld [vmem:[%s703_s1 + $0x8] sm:$0xff]  ;;  %v65_v2 = vld [vmem:[%s703_s1 + $0x10] sm:$0xff] }
   0x2   :  { %v452_v3 = vpack.c.bf16 %v64_v1, %v63_v0  ;;  %v66_v4 = vld [vmem:[%s703_s1 + $0x18] sm:$0xff]  ;;  %v67_v6 = vld [vmem:[%s703_s1 + $0x20] sm:$0xff]  ;;  %v68_v7 = vld [vmem:[%s703_s1 + $0x28] sm:$0xff]  ;;  %v262_v41 = vshrl.u32 %v261_v40, 7  ;;  %v613_v43 = vand.u32 127, %v261_v40 }
   0x3   :  { %v456_v5 = vpack.c.bf16 %v66_v4, %v65_v2  ;;  %v460_v8 = vpack.c.bf16 %v68_v7, %v67_v6  ;;  %v47_v9 = vld [vmem:[%s704_s0] sm:$0xff]  ;;  %v69_v11 = vld [vmem:[%s703_s1 + $0x30] sm:$0xff]  ;;  %v70_v12 = vld [vmem:[%s703_s1 + $0x38] sm:$0xff] }
   0x4   :  { %453 = vmatprep.subr.bf16.mxu0 %v452_v3  ;;  %484 = vmatprep.subr.bf16.mxu1 %v452_v3  ;;  %v55_v10 = vld [vmem:[%s704_s0 + $0x40] sm:$0xff]  ;;  %v464_v13 = vpack.c.bf16 %v70_v12, %v69_v11  ;;  %v72_v15 = vld [vmem:[%s703_s1 + $0x48] sm:$0xff]  ;;  %v73_v17 = vld [vmem:[%s703_s1 + $0x50] sm:$0xff]  ;;  %v263_v42 = vadd.s32 8, %v262_v41  ;;  %v271_v44 = vadd.s32 72, %v262_v41  ;;  %v270_v45 = vadd.s32 64, %v262_v41 }
   0x5   :  { %455 = vmatpush3.bf16.msra.mxu0 %v452_v3  ;;  %492 = vmatpush3.bf16.msra.mxu1 %v452_v3  ;;  %v71_v14 = vld [vmem:[%s703_s1 + $0x40] sm:$0xff]  ;;  %v74_v18 = vld [vmem:[%s703_s1 + $0x58] sm:$0xff]  ;;  %v76_v21 = vld [vmem:[%s703_s1 + $0x68] sm:$0xff]  ;;  %v265_v46 = vadd.s32 24, %v262_v41  ;;  %v273_v47 = vadd.s32 88, %v262_v41  ;;  %vm296_vm2 = vcmp.eq.s32.totalorder %v262_v41, %v613_v43  ;;  %v264_v48 = vadd.s32 16, %v262_v41 }
   0x6   :  { %457 = vmatprep.subr.bf16.mxu0 %v456_v5  ;;  %485 = vmatprep.subr.bf16.mxu1 %v456_v5  ;;  %v468_v16 = vpack.c.bf16 %v72_v15, %v71_v14  ;;  %v472_v19 = vpack.c.bf16 %v74_v18, %v73_v17  ;;  %v75_v20 = vld [vmem:[%s703_s1 + $0x60] sm:$0xff]  ;;  %v77_v23 = vld [vmem:[%s703_s1 + $0x70] sm:$0xff]  ;;  %v78_v24 = vld [vmem:[%s703_s1 + $0x78] sm:$0xff]  ;;  %vm297_vm0 = vcmp.eq.s32.totalorder %v263_v42, %v613_v43  ;;  %v272_v49 = vadd.s32 80, %v262_v41 }
   0x7   :  { %428 = vmatprep.mubr.f32.mxu0 %v47_v9  ;;  %440 = vmatprep.mubr.f32.mxu1 %v55_v10  ;;  %v476_v22 = vpack.c.bf16 %v76_v21, %v75_v20  ;;  %v480_v25 = vpack.c.bf16 %v78_v24, %v77_v23  ;;  %v48_v26 = vld [vmem:[%s704_s0 + $0x8] sm:$0xff]  ;;  %v49_v28 = vld [vmem:[%s704_s0 + $0x10] sm:$0xff]  ;;  %v50_v30 = vld [vmem:[%s704_s0 + $0x18] sm:$0xff]  ;;  %vm305_vm1 = vcmp.eq.s32.totalorder %v271_v44, %v613_v43  ;;  %v313_v51 = vsel %vm297_vm0, 0.1, %v501_v50 }
   0x8   :  { %v56_v27 = vld [vmem:[%s704_s0 + $0x48] sm:$0xff]  ;;  %v57_v29 = vld [vmem:[%s704_s0 + $0x50] sm:$0xff]  ;;  %v58_v31 = vld [vmem:[%s704_s0 + $0x58] sm:$0xff]  ;;  %vm304_vm3 = vcmp.eq.s32.totalorder %v270_v45, %v613_v43  ;;  %v321_v52 = vsel %vm305_vm1, 0.1, %v501_v50  ;;  %vm299_vm4 = vcmp.eq.s32.totalorder %v265_v46, %v613_v43  ;;  %vm307_vm5 = vcmp.eq.s32.totalorder %v273_v47, %v613_v43 }
   0x9   :  { %459 = vmatpush3.bf16.msra.mxu0 %v456_v5  ;;  %493 = vmatpush3.bf16.msra.mxu1 %v456_v5  ;;  %v51_v32 = vld [vmem:[%s704_s0 + $0x20] sm:$0xff]  ;;  %v52_v34 = vld [vmem:[%s704_s0 + $0x28] sm:$0xff]  ;;  %v53_v36 = vld [vmem:[%s704_s0 + $0x30] sm:$0xff]  ;;  %v312_v53 = vsel %vm296_vm2, 0.1, %v501_v50  ;;  %vm298_vm6 = vcmp.eq.s32.totalorder %v264_v48, %v613_v43  ;;  %vm306_vm7 = vcmp.eq.s32.totalorder %v272_v49, %v613_v43  ;;  %v267_v54 = vadd.s32 40, %v262_v41 }
   0xa   :  { %461 = vmatprep.subr.bf16.mxu0 %v460_v8  ;;  %486 = vmatprep.subr.bf16.mxu1 %v460_v8  ;;  %v59_v33 = vld [vmem:[%s704_s0 + $0x60] sm:$0xff]  ;;  %v60_v35 = vld [vmem:[%s704_s0 + $0x68] sm:$0xff]  ;;  %v61_v37 = vld [vmem:[%s704_s0 + $0x70] sm:$0xff]  ;;  %v275_v55 = vadd.s32 104, %v262_v41  ;;  %v320_v58 = vsel %vm304_vm3, 0.1, %v501_v50 }
   0xb   :  { %v54_v38 = vld [vmem:[%s704_s0 + $0x38] sm:$0xff]  ;;  %v266_v59 = vadd.s32 32, %v262_v41  ;;  %v274_v60 = vadd.s32 96, %v262_v41  ;;  %v315_v63 = vsel %vm299_vm4, 0.1, %v501_v50  ;;  %vm301_vm8 = vcmp.eq.s32.totalorder %v267_v54, %v613_v43 }
   0xc   :  { %v62_v39 = vld [vmem:[%s704_s0 + $0x78] sm:$0xff]  ;;  %v323_v0 = vsel %vm307_vm5, 0.1, %v501_v50  ;;  %v314_v1 = vsel %vm298_vm6, 0.1, %v501_v50  ;;  %vm309_vm9 = vcmp.eq.s32.totalorder %v275_v55, %v613_v43  ;;  %v269_v11 = vadd.s32 56, %v262_v41 }
   0xd   :  { %463 = vmatpush3.bf16.msra.mxu0 %v460_v8  ;;  %494 = vmatpush3.bf16.msra.mxu1 %v460_v8  ;;  %v322_v2 = vsel %vm306_vm7, 0.1, %v501_v50  ;;  %vm300_vm10 = vcmp.eq.s32.totalorder %v266_v59, %v613_v43  ;;  %vm308_vm11 = vcmp.eq.s32.totalorder %v274_v60, %v613_v43  ;;  %v277_v12 = vadd.s32 120, %v262_v41 }
   0xe   :  { %465 = vmatprep.subr.bf16.mxu0 %v464_v13  ;;  %487 = vmatprep.subr.bf16.mxu1 %v464_v13  ;;  %v276_v14 = vadd.s32 112, %v262_v41  ;;  %v317_v17 = vsel %vm301_vm8, 0.1, %v501_v50  ;;  %v325_v18 = vsel %vm309_vm9, 0.1, %v501_v50  ;;  %vm303_vm12 = vcmp.eq.s32.totalorder %v269_v11, %v613_v43 }
   0xf   :  { %v316_v23 = vsel %vm300_vm10, 0.1, %v501_v50  ;;  %v324_v24 = vsel %vm308_vm11, 0.1, %v501_v50  ;;  %vm311_vm13 = vcmp.eq.s32.totalorder %v277_v12, %v613_v43 }
  0x10   :  { %vm310_vm15 = vcmp.eq.s32.totalorder %v276_v14, %v613_v43 }
  0x11   :  { %467 = vmatpush3.bf16.msra.mxu0 %v464_v13  ;;  %495 = vmatpush3.bf16.msra.mxu1 %v464_v13  ;;  %v268_v13 = vadd.s32 48, %v262_v41 }
  0x12   :  { %469 = vmatprep.subr.bf16.mxu0 %v468_v16  ;;  %488 = vmatprep.subr.bf16.mxu1 %v468_v16 }
  0x13   :  { %vm302_vm14 = vcmp.eq.s32.totalorder %v268_v13, %v613_v43 }
  0x15   :  { %471 = vmatpush3.bf16.msra.mxu0 %v468_v16  ;;  %496 = vmatpush3.bf16.msra.mxu1 %v468_v16 }
  0x16   :  { %473 = vmatprep.subr.bf16.mxu0 %v472_v19  ;;  %489 = vmatprep.subr.bf16.mxu1 %v472_v19 }
  0x19   :  { %475 = vmatpush3.bf16.msra.mxu0 %v472_v19  ;;  %497 = vmatpush3.bf16.msra.mxu1 %v472_v19 }
  0x1a   :  { %477 = vmatprep.subr.bf16.mxu0 %v476_v22  ;;  %490 = vmatprep.subr.bf16.mxu1 %v476_v22 }
  0x1d   :  { %479 = vmatpush3.bf16.msra.mxu0 %v476_v22  ;;  %498 = vmatpush3.bf16.msra.mxu1 %v476_v22 }
  0x1e   :  { %481 = vmatprep.subr.bf16.mxu0 %v480_v25  ;;  %491 = vmatprep.subr.bf16.mxu1 %v480_v25 }
  0x21   :  { %483 = vmatpush3.bf16.msra.mxu0 %v480_v25  ;;  %499 = vmatpush3.bf16.msra.mxu1 %v480_v25 }
  0x24   :  { %429 = vmatmul.mubr.f32.vlgmr.msra.gmra.mrb[0].mxu0 %v48_v26  ;;  %441 = vmatmul.mubr.f32.vlgmr.msra.gmra.mrb[0].mxu1 %v56_v27 }
  0x25   :  { %431 = vmatprep.mubr.f32.mxu0 %v49_v28  ;;  %443 = vmatprep.mubr.f32.mxu1 %v57_v29 }
  0x28   :  { %432 = vmatmul.mubr.f32.gmra.mrb[2].mxu0 %v50_v30  ;;  %444 = vmatmul.mubr.f32.gmra.mrb[2].mxu1 %v58_v31 }
  0x29   :  { %434 = vmatprep.mubr.f32.mxu0 %v51_v32  ;;  %446 = vmatprep.mubr.f32.mxu1 %v59_v33  ;;  %v319_v32 = vsel %vm303_vm12, 0.1, %v501_v50 }
  0x2c   :  { %435 = vmatmul.mubr.f32.gmra.mrb[4].mxu0 %v52_v34  ;;  %447 = vmatmul.mubr.f32.gmra.mrb[4].mxu1 %v60_v35  ;;  %v327_v34 = vsel %vm311_vm13, 0.1, %v501_v50 }
  0x2d   :  { %437 = vmatprep.mubr.f32.mxu0 %v53_v36  ;;  %449 = vmatprep.mubr.f32.mxu1 %v61_v37  ;;  %v318_v36 = vsel %vm302_vm14, 0.1, %v501_v50 }
  0x30   :  { %438 = vmatmul.mubr.f32.gmra.mrb[6].mxu0 %v54_v38  ;;  %450 = vmatmul.mubr.f32.gmra.mrb[6].mxu1 %v62_v39  ;;  %v326_v38 = vsel %vm310_vm15, 0.1, %v501_v50 }
  0xf7   :  { %v430_v56 = vpop.f32.mrb[0].mxu0  ;;  %v442_v57 = vpop.f32.mrb[0].mxu1 }
  0xf8   :  { %v145_v61 = vpop.f32.mrb[1].mxu0  ;;  %v185_v62 = vpop.f32.mrb[1].mxu1  ;;  %v329_v3 = vadd.f32 %v430_v56, %v313_v51  ;;  %v337_v4 = vadd.f32 %v442_v57, %v321_v52 }
  0xf9   :  { %v328_v5 = vadd.f32 %v312_v53, %v145_v61  ;;  %v336_v6 = vadd.f32 %v320_v58, %v185_v62 }
  0xfa   :  { %345 = vst [vmem:[%s705_s2 + $0x8] sm:$0xff] %v329_v3  ;;  %353 = vst [vmem:[%s705_s2 + $0x48] sm:$0xff] %v337_v4 }
  0xfb   :  { %v433_v7 = vpop.f32.mrb[2].mxu0  ;;  %v445_v8 = vpop.f32.mrb[2].mxu1  ;;  %344 = vst [vmem:[%s705_s2] sm:$0xff] %v328_v5  ;;  %352 = vst [vmem:[%s705_s2 + $0x40] sm:$0xff] %v336_v6 }
  0xfc   :  { %v155_v9 = vpop.f32.mrb[3].mxu0  ;;  %v195_v10 = vpop.f32.mrb[3].mxu1  ;;  %v331_v15 = vadd.f32 %v433_v7, %v315_v63  ;;  %v339_v16 = vadd.f32 %v445_v8, %v323_v0 }
  0xfd   :  { %v330_v19 = vadd.f32 %v314_v1, %v155_v9  ;;  %v338_v20 = vadd.f32 %v322_v2, %v195_v10 }
  0xfe   :  { %347 = vst [vmem:[%s705_s2 + $0x18] sm:$0xff] %v331_v15  ;;  %355 = vst [vmem:[%s705_s2 + $0x58] sm:$0xff] %v339_v16 }
  0xff   :  { %v436_v21 = vpop.f32.mrb[4].mxu0  ;;  %v448_v22 = vpop.f32.mrb[4].mxu1  ;;  %346 = vst [vmem:[%s705_s2 + $0x10] sm:$0xff] %v330_v19  ;;  %354 = vst [vmem:[%s705_s2 + $0x50] sm:$0xff] %v338_v20 }
 0x100   :  { %v165_v25 = vpop.f32.mrb[5].mxu0  ;;  %v205_v26 = vpop.f32.mrb[5].mxu1  ;;  %v333_v27 = vadd.f32 %v436_v21, %v317_v17  ;;  %v341_v28 = vadd.f32 %v448_v22, %v325_v18 }
 0x101   :  { %v332_v29 = vadd.f32 %v316_v23, %v165_v25  ;;  %v340_v30 = vadd.f32 %v324_v24, %v205_v26 }
 0x102   :  { %349 = vst [vmem:[%s705_s2 + $0x28] sm:$0xff] %v333_v27  ;;  %357 = vst [vmem:[%s705_s2 + $0x68] sm:$0xff] %v341_v28 }
 0x103   :  { %v439_v31 = vpop.f32.mrb[6].mxu0  ;;  %v451_v33 = vpop.f32.mrb[6].mxu1  ;;  %348 = vst [vmem:[%s705_s2 + $0x20] sm:$0xff] %v332_v29  ;;  %356 = vst [vmem:[%s705_s2 + $0x60] sm:$0xff] %v340_v30 }
 0x104   :  { %v175_v35 = vpop.f32.mrb[7].mxu0  ;;  %v215_v37 = vpop.f32.mrb[7].mxu1  ;;  %v335_v39 = vadd.f32 %v439_v31, %v319_v32  ;;  %v343_v40 = vadd.f32 %v451_v33, %v327_v34 }
 0x105   :  { %v334_v41 = vadd.f32 %v318_v36, %v175_v35  ;;  %v342_v42 = vadd.f32 %v326_v38, %v215_v37 }
 0x106   :  { %351 = vst [vmem:[%s705_s2 + $0x38] sm:$0xff] %v335_v39  ;;  %359 = vst [vmem:[%s705_s2 + $0x78] sm:$0xff] %v343_v40 }
 0x107   :  { %350 = vst [vmem:[%s705_s2 + $0x30] sm:$0xff] %v334_v41  ;;  %358 = vst [vmem:[%s705_s2 + $0x70] sm:$0xff] %v342_v42 }

</bundles_post_ra>
